<compile_context>
chip_gen: v6e
topology: v6e:2x2x1
jax: 0.10.0
libtpu: 0.0.40
codegen_flags: <defaults>
</compile_context>

<pallas_src>
import jax
import jax.numpy as jnp
from jax import lax
from jax.experimental import pallas as pl
from jax.experimental.pallas import tpu as pltpu


# ---------------------------------------------------------------------------
# Kernel
# ---------------------------------------------------------------------------
def film_kernel(patch_ref, wconv_ref, ss_ref, o_ref):
    """relu(scale * conv + shift) for one (batch-block, HW-tile).

      patch_ref : (Nb, Kp, THW)    bf16  im2col patches (lanes = HW)
      wconv_ref : (Cout, Kp)       bf16  conv weight  (grid-resident)
      ss_ref    : (Nb, 2, Cout, 1) f32   pre-folded FiLM (scale, shift)
      o_ref     : (Nb, Cout, THW)  f32
    """
    w = wconv_ref[...]
    for i in range(patch_ref.shape[0]):          # static batch unroll (Nb small)
        conv = jnp.dot(w, patch_ref[i], preferred_element_type=jnp.float32)
        ab = ss_ref[i]                           # (2, Cout, 1) f32
        o_ref[i] = jnp.maximum(ab[0] * conv + ab[1], 0.0).astype(o_ref.dtype)


# ---------------------------------------------------------------------------
# Wrapper helpers
# ---------------------------------------------------------------------------
def _im2col_nchw_transposed(x, kh, kw):
    """x: (N, Cin, H, W) -> patches (N, Cin*kh*kw, H*W), stride 1, SAME pad.

    k runs as (ci, kh, kw), matching w_conv.reshape(Cout, Cin*kh*kw).
    Pure data rearrangement (no FLOPs) done by XLA.
    """
    N, C, H, W = x.shape
    ph, pw = kh // 2, kw // 2
    xp = jnp.pad(x, ((0, 0), (0, 0), (ph, ph), (pw, pw)))
    cols = [xp[:, :, i:i + H, j:j + W] for i in range(kh) for j in range(kw)]
    patches = jnp.stack(cols, axis=2)            # (N, Cin, kh*kw, H, W)
    return patches.reshape(N, C * kh * kw, H * W)


_VMEM_BLOCK_BUDGET = 12 * 1024 * 1024            # fits v5e 16 MiB / v7x 32 MiB scoped


def _block_bytes(n_blk, kp, cout, thw):
    # double-buffered patch + output blocks, plus resident weight / FiLM params
    return (2 * (n_blk * kp * thw * 2 + n_blk * cout * thw * 4)
            + cout * kp * 2 + n_blk * 2 * cout * 4)


def _pick_tiling(N, Kp, Cout, HW):
    """Largest batch block + largest 128-multiple HW tile that fit VMEM."""
    n_blk = 1
    for nb in range(N, 0, -1):
        if N % nb == 0 and _block_bytes(nb, Kp, Cout, 128) <= _VMEM_BLOCK_BUDGET:
            n_blk = nb
            break
    cands = [c for c in (8192, 4096, 2048, 1024, 512, 256, 128)
             if HW % c == 0 and _block_bytes(n_blk, Kp, Cout, c) <= _VMEM_BLOCK_BUDGET]
    split = [c for c in cands if c < HW]         # prefer >=2 HW steps (v7x megacore)
    if split:
        thw = split[0]
    elif cands:
        thw = cands[0]
    else:
        thw = HW  # fallback: HW not a 128-multiple -> single (lane-masked) block
    return n_blk, thw


# ---------------------------------------------------------------------------
# Forward
# ---------------------------------------------------------------------------
def film_forward(prev, wiki, inv, task, pos, params):
    """prev/pos are NCHW (PyTorch convention); output is NCHW f32."""
    w_conv, b_conv = params["w_conv"], params["b_conv"]   # (Cout,Cin,3,3), (Cout,)
    w_lin, b_lin = params["w_lin"], params["b_lin"]       # (2*Cout,Dtxt), (2*Cout,)

    x = jnp.concatenate([prev, pos], axis=1)              # (N, Cin, H, W)
    N, Cin, H, W = x.shape
    Cout, _, KH, KW = w_conv.shape
    HW = H * W
    K = KH * KW * Cin
    Kp = ((K + 15) // 16) * 16                            # bf16 sublane-aligned K

    # --- gamma/beta: tiny matmul -> plain XLA (no pallas_call), then pre-fold
    #     (1+g)*(conv+b)+be == scale*conv + shift into one small array --------
    text = jnp.concatenate([wiki, inv, task], axis=1)     # (N, Dtxt)
    gb = jnp.einsum("nd,cd->nc", text, w_lin) + b_lin     # no w_lin.T materialization
    gamma, beta = gb[:, :Cout], gb[:, Cout:]              # torch.chunk order
    scale = 1.0 + gamma
    shift = scale * b_conv[None, :] + beta
    ss = jnp.stack([scale, shift], axis=1)[..., None].astype(jnp.float32)  # (N,2,Cout,1)

    # --- im2col patches (data movement only), lane axis = HW, bf16 MXU feed ---
    patches = _im2col_nchw_transposed(x.astype(jnp.bfloat16), KH, KW)  # (N,K,HW) bf16
    patches = jnp.pad(patches, ((0, 0), (0, Kp - K), (0, 0)))
    w_mat = jnp.pad(w_conv.reshape(Cout, K), ((0, 0), (0, Kp - K))).astype(jnp.bfloat16)

    # --- tiling: fold batch into the step, HW (128-multiple) on lanes ---------
    n_blk, thw = _pick_tiling(N, Kp, Cout, HW)
    n_b, n_hw = N // n_blk, HW // thw
    vmem_limit = int(min(max(2 * _block_bytes(n_blk, Kp, Cout, thw), 16 << 20), 32 << 20))

    cost = pl.CostEstimate(
        flops=2 * N * Cout * Kp * HW,
        transcendentals=0,
        bytes_accessed=(N * Kp * HW * 2 + Cout * Kp * 2
                        + N * 2 * Cout * 4 + N * Cout * HW * 4))

    out_flat = pl.pallas_call(
        film_kernel,
        out_shape=jax.ShapeDtypeStruct((N, Cout, HW), jnp.float32),
        # With batch folded, n_b is typically 1 and the HW axis carries the
        # (megacore-shardable) parallelism.
        grid=(n_b, n_hw),
        in_specs=[
            pl.BlockSpec((n_blk, Kp, thw), lambda b, h: (b, 0, h)),       # patches
            pl.BlockSpec((Cout, Kp), lambda b, h: (0, 0)),                # conv weight
            pl.BlockSpec((n_blk, 2, Cout, 1), lambda b, h: (b, 0, 0, 0)),  # scale/shift
        ],
        out_specs=pl.BlockSpec((n_blk, Cout, thw), lambda b, h: (b, 0, h)),
        compiler_params=pltpu.CompilerParams(
            dimension_semantics=("parallel", "parallel"),
            vmem_limit_bytes=vmem_limit),
        cost_estimate=cost,
    )(patches, w_mat, ss)

    # (N, Cout, HW) is already NCHW-ordered: reshape only, no transpose.
    return out_flat.reshape(N, Cout, H, W)


# ---------------------------------------------------------------------------
# Pure-JAX reference (mirrors the PyTorch forward, NCHW)
# ---------------------------------------------------------------------------
def film_reference(prev, wiki, inv, task, pos, params):
    x = jnp.concatenate([prev, pos], axis=1)
    text = jnp.concatenate([wiki, inv, task], axis=1)
    gb = text @ params["w_lin"].T + params["b_lin"]
    Cout = params["w_conv"].shape[0]
    gamma, beta = gb[:, :Cout], gb[:, Cout:]
    conv = lax.conv_general_dilated(
        x, params["w_conv"], window_strides=(1, 1), padding="SAME",
        dimension_numbers=("NCHW", "OIHW", "NCHW"),
        precision=lax.Precision.HIGHEST,
    ) + params["b_conv"].reshape(1, Cout, 1, 1)
    y = (1.0 + gamma[:, :, None, None]) * conv + beta[:, :, None, None]
    return jnp.maximum(y, 0.0)


if __name__ == "__main__":
    # module hyperparameters (small, consistent with FILM.__init__)
    drnn, demb, dchannel = 16, 4, 8
    N, H, W = 2, 16, 16
    c_prev, c_pos = 4, 2
    Cin = c_prev + c_pos
    Dtxt = 1 * drnn + 2 * 2 * demb            # Linear input dim

    key = jax.random.PRNGKey(0)
    keys = jax.random.split(key, 9)

    prev = jax.random.normal(keys[0], (N, c_prev, H, W), jnp.float32)
    pos = jax.random.normal(keys[1], (N, c_pos, H, W), jnp.float32)
    wiki = jax.random.normal(keys[2], (N, 2 * demb), jnp.float32)
    inv = jax.random.normal(keys[3], (N, 2 * demb), jnp.float32)
    task = jax.random.normal(keys[4], (N, drnn), jnp.float32)

    params = {
        "w_conv": 0.1 * jax.random.normal(keys[5], (dchannel, Cin, 3, 3), jnp.float32),
        "b_conv": 0.1 * jax.random.normal(keys[6], (dchannel,), jnp.float32),
        "w_lin": 0.1 * jax.random.normal(keys[7], (2 * dchannel, Dtxt), jnp.float32),
        "b_lin": 0.1 * jax.random.normal(keys[8], (2 * dchannel,), jnp.float32),
    }

    out = jax.jit(film_forward)(prev, wiki, inv, task, pos, params)
    out = jax.block_until_ready(out)

    ref = film_reference(prev, wiki, inv, task, pos, params)
    assert out.shape == (N, dchannel, H, W), out.shape
    max_err = float(jnp.max(jnp.abs(out - ref)))
    # bf16 MXU inputs (f32 accumulation) vs an f32 HIGHEST-precision reference.
    assert jnp.allclose(out, ref, atol=2e-2, rtol=2e-2), max_err

    print("KERNEL_OK")
</pallas_src>

<mosaic_0001>
module attributes {stable_mosaic.version = 11 : i64} {
  func.func @film_kernel(%arg0: i32, %arg1: i32, %arg2: memref<2x64x128xbf16, #tpu.memory_space<vmem>>, %arg3: memref<8x64xbf16, #tpu.memory_space<vmem>>, %arg4: memref<2x2x8x1xf32, #tpu.memory_space<vmem>>, %arg5: memref<2x8x128xf32, #tpu.memory_space<vmem>>) attributes {dimension_semantics = [#tpu.dimension_semantics<parallel>, #tpu.dimension_semantics<parallel>], iteration_bounds = array<i64: 1, 2>, scalar_prefetch = 0 : i64, scratch_operands = 0 : i64, tpu.core_type = #tpu.core_type<tc>, window_params = [{transform_indices = @transform_0, window_bounds = array<i64: 2, 64, 128>}, {pipeline_mode = #tpu.pipeline_mode<synchronous>, transform_indices = @transform_1, window_bounds = array<i64: 8, 64>}, {transform_indices = @transform_2, window_bounds = array<i64: 2, 2, 8, 1>}, {transform_indices = @transform_3, window_bounds = array<i64: 2, 8, 128>}]} {
    %c0 = arith.constant 0 : index
    %c0_0 = arith.constant 0 : index
    %0 = vector.load %arg3[%c0, %c0_0] : memref<8x64xbf16, #tpu.memory_space<vmem>>, vector<8x64xbf16>
    %c0_1 = arith.constant 0 : index
    %c0_2 = arith.constant 0 : index
    %c0_3 = arith.constant 0 : index
    %1 = vector.load %arg2[%c0_1, %c0_2, %c0_3] : memref<2x64x128xbf16, #tpu.memory_space<vmem>>, vector<1x64x128xbf16>
    %2 = vector.shape_cast %1 : vector<1x64x128xbf16> to vector<64x128xbf16>
    %cst = arith.constant dense<0.000000e+00> : vector<8x128xf32>
    %3 = tpu.matmul %0, %2, %cst {dimension_numbers = #tpu.dot_dimension_numbers<[1], [0], [0], [1], [0, 0, 1, 1], [], []>} : vector<8x64xbf16>, vector<64x128xbf16>, vector<8x128xf32> -> vector<8x128xf32>
    %c0_4 = arith.constant 0 : index
    %c0_5 = arith.constant 0 : index
    %c0_6 = arith.constant 0 : index
    %c0_7 = arith.constant 0 : index
    %4 = vector.load %arg4[%c0_4, %c0_5, %c0_6, %c0_7] : memref<2x2x8x1xf32, #tpu.memory_space<vmem>>, vector<1x2x8x1xf32>
    %5 = vector.shape_cast %4 : vector<1x2x8x1xf32> to vector<2x8x1xf32>
    %6 = vector.extract_strided_slice %5 {offsets = [0, 0, 0], sizes = [1, 8, 1], strides = [1, 1, 1]} : vector<2x8x1xf32> to vector<1x8x1xf32>
    %7 = vector.shape_cast %6 : vector<1x8x1xf32> to vector<8x1xf32>
    %8 = vector.broadcast %7 : vector<8x1xf32> to vector<8x128xf32>
    %9 = arith.mulf %8, %3 : vector<8x128xf32>
    %10 = vector.extract_strided_slice %5 {offsets = [1, 0, 0], sizes = [1, 8, 1], strides = [1, 1, 1]} : vector<2x8x1xf32> to vector<1x8x1xf32>
    %11 = vector.shape_cast %10 : vector<1x8x1xf32> to vector<8x1xf32>
    %12 = vector.broadcast %11 : vector<8x1xf32> to vector<8x128xf32>
    %13 = arith.addf %9, %12 : vector<8x128xf32>
    %cst_8 = arith.constant 0.000000e+00 : f32
    %14 = vector.broadcast %cst_8 : f32 to vector<8x128xf32>
    %15 = arith.maximumf %13, %14 : vector<8x128xf32>
    %c0_9 = arith.constant 0 : index
    %c0_10 = arith.constant 0 : index
    %c0_11 = arith.constant 0 : index
    %16 = vector.load %arg5[%c0_9, %c0_10, %c0_11] : memref<2x8x128xf32, #tpu.memory_space<vmem>>, vector<1x8x128xf32>
    %17 = vector.shape_cast %16 : vector<1x8x128xf32> to vector<8x128xf32>
    %18 = vector.shape_cast %15 : vector<8x128xf32> to vector<1x8x128xf32>
    tpu.vector_store %arg5[%c0_9, %c0_10, %c0_11], %18 {strides = array<i32>} : memref<2x8x128xf32, #tpu.memory_space<vmem>>, vector<1x8x128xf32>,
    %c1 = arith.constant 1 : index
    %c0_12 = arith.constant 0 : index
    %c0_13 = arith.constant 0 : index
    %19 = vector.load %arg2[%c1, %c0_12, %c0_13] : memref<2x64x128xbf16, #tpu.memory_space<vmem>>, vector<1x64x128xbf16>
    %20 = vector.shape_cast %19 : vector<1x64x128xbf16> to vector<64x128xbf16>
    %cst_14 = arith.constant dense<0.000000e+00> : vector<8x128xf32>
    %21 = tpu.matmul %0, %20, %cst_14 {dimension_numbers = #tpu.dot_dimension_numbers<[1], [0], [0], [1], [0, 0, 1, 1], [], []>} : vector<8x64xbf16>, vector<64x128xbf16>, vector<8x128xf32> -> vector<8x128xf32>
    %c1_15 = arith.constant 1 : index
    %c0_16 = arith.constant 0 : index
    %c0_17 = arith.constant 0 : index
    %c0_18 = arith.constant 0 : index
    %22 = vector.load %arg4[%c1_15, %c0_16, %c0_17, %c0_18] : memref<2x2x8x1xf32, #tpu.memory_space<vmem>>, vector<1x2x8x1xf32>
    %23 = vector.shape_cast %22 : vector<1x2x8x1xf32> to vector<2x8x1xf32>
    %24 = vector.extract_strided_slice %23 {offsets = [0, 0, 0], sizes = [1, 8, 1], strides = [1, 1, 1]} : vector<2x8x1xf32> to vector<1x8x1xf32>
    %25 = vector.shape_cast %24 : vector<1x8x1xf32> to vector<8x1xf32>
    %26 = vector.broadcast %25 : vector<8x1xf32> to vector<8x128xf32>
    %27 = arith.mulf %26, %21 : vector<8x128xf32>
    %28 = vector.extract_strided_slice %23 {offsets = [1, 0, 0], sizes = [1, 8, 1], strides = [1, 1, 1]} : vector<2x8x1xf32> to vector<1x8x1xf32>
    %29 = vector.shape_cast %28 : vector<1x8x1xf32> to vector<8x1xf32>
    %30 = vector.broadcast %29 : vector<8x1xf32> to vector<8x128xf32>
    %31 = arith.addf %27, %30 : vector<8x128xf32>
    %cst_19 = arith.constant 0.000000e+00 : f32
    %32 = vector.broadcast %cst_19 : f32 to vector<8x128xf32>
    %33 = arith.maximumf %31, %32 : vector<8x128xf32>
    %c1_20 = arith.constant 1 : index
    %c0_21 = arith.constant 0 : index
    %c0_22 = arith.constant 0 : index
    %34 = vector.load %arg5[%c1_20, %c0_21, %c0_22] : memref<2x8x128xf32, #tpu.memory_space<vmem>>, vector<1x8x128xf32>
    %35 = vector.shape_cast %34 : vector<1x8x128xf32> to vector<8x128xf32>
    %36 = vector.shape_cast %33 : vector<8x128xf32> to vector<1x8x128xf32>
    tpu.vector_store %arg5[%c1_20, %c0_21, %c0_22], %36 {strides = array<i32>} : memref<2x8x128xf32, #tpu.memory_space<vmem>>, vector<1x8x128xf32>,
    return
  }
  func.func @transform_0(%arg0: i32, %arg1: i32) -> (i32, i32, i32) {
    %c0_i32 = arith.constant 0 : i32
    %c0_i32_0 = arith.constant 0 : i32
    return %arg0, %c0_i32, %arg1 : i32, i32, i32
  }
  func.func @transform_1(%arg0: i32, %arg1: i32) -> (i32, i32) {
    %c0_i32 = arith.constant 0 : i32
    %c0_i32_0 = arith.constant 0 : i32
    %c0_i32_1 = arith.constant 0 : i32
    return %c0_i32, %c0_i32_0 : i32, i32
  }
  func.func @transform_2(%arg0: i32, %arg1: i32) -> (i32, i32, i32, i32) {
    %c0_i32 = arith.constant 0 : i32
    %c0_i32_0 = arith.constant 0 : i32
    %c0_i32_1 = arith.constant 0 : i32
    %c0_i32_2 = arith.constant 0 : i32
    return %arg0, %c0_i32, %c0_i32_0, %c0_i32_1 : i32, i32, i32, i32
  }
  func.func @transform_3(%arg0: i32, %arg1: i32) -> (i32, i32, i32) {
    %c0_i32 = arith.constant 0 : i32
    %c0_i32_0 = arith.constant 0 : i32
    return %arg0, %c0_i32, %arg1 : i32, i32, i32
  }
}

</mosaic_0001>

<bundles_post_ra>
// kernel: film_forward.1
= control target key start
LH: loop header
LB: loop body
LE: loop exit
PB: predicated region body
PF: predicated region fallthrough
CT: control target
= control target key end

     0   :  { %s817_s12 = smov 0   ;;  %s819_s13 = smov 0   ;;  %s926_s0 = inlined_call_operand.vmem [shape: bf16[2,64,256], index: 0, kind: input, shape index: {}]   ;;  %s927_s1 = inlined_call_operand.vmem [shape: bf16[8,64], index: 1, kind: input, shape index: {}]   ;;  %s928_s2 = inlined_call_operand.vmem [shape: f32[2,2,8,1], index: 2, kind: input, shape index: {}]   ;;  %s929_s3 = inlined_call_operand.vmem [shape: f32[2,8,256], index: 3, kind: output, shape index: {}]  }
   0x1   :  { %s821_s14 = smov 0   ;;  %s823_s15 = smov 0  }
   0x2   :  { %s825_s16 = smov 0  }
   0x3 LB: > { %s22_s17 = sadd.s32 1, %s788_s15  ;;  %s632_s18 = sadd.s32 4294967295, %s792_s16   ;;  %s792_s16 = sphi %s825_s16, %s13_s16   ;;  %s788_s15 = sphi %s823_s15, %s934_s15   ;;  %s784_s14 = sphi %s821_s14, %s933_s14   ;;  %s780_s13 = sphi %s819_s13, %s932_s13   ;;  %s776_s12 = sphi %s817_s12, %s931_s12  }
   0x4   : > { %p23_p0 = scmp.ge.s32.totalorder %s22_s17, 2  ;;  %p41_p1 = scmp.ne.s32.totalorder %s780_s13, %s776_s12 }
   0x5   : > { %p42_p2 = scmp.eq.s32.totalorder %s792_s16, 0  ;;  %p120_p4 = scmp.eq.s32.totalorder %s632_s18, 1 }
   0x6   : > { %s936_s17 = smov (%p23_p0, %s22_s17), 0  ;;  %s34_s20 = sadd.s32 1, %s780_s13 }
   0x7   : > { %p43_p3 = por %p42_p2, %p41_p1  ;;  %s30_s19 = ssub.s32 %s788_s15, %s936_s17 }
   0x8   : > { %p32_p5 = scmp.eq.s32.totalorder %s30_s19, 0  ;;  %p852_p6 = por %p120_p4, %p41_p1 }
   0x9   : > { %p636_p7 = scmp.ge.s32.totalorder %s792_s16, 2 }
   0xa   : > { %s857_s22 = scalar_select %p32_p5, %s780_s13, %s34_s20  }
   0xb   : > { %155 = sbr.rel (%p636_p7) target bundleno = 30 (0x1e), region = 24 }
  0x10   : > { %158 = sbr.rel (!%p43_p3) target bundleno = 30 (0x1e), region = 28  ;;  %s160_s23 = sand.u32 (%p43_p3), 1, %s780_s13  }
  0x11   : > { %s638_s24 = sshll.u32 (%p43_p3), %s788_s15, 2  ;;  %s637_s25 = sshll.u32 (%p43_p3), %s160_s23, 6 }
  0x12   : > { %s865_s28 = scalar_lea.vmem (%p43_p3), %s926_s0, %s638_s24  ;;  %s162_s29 = scalar_lea.vmem (%p43_p3), [#allocation2], %s637_s25 }
  0x13   : > { %v184_v0 = vld [vmem:[%s865_s28] sm:$0xf] (%p43_p3)  ;;  %v186_v1 = vld [vmem:[%s865_s28 + $0x8] sm:$0xf] (%p43_p3)  ;;  %v188_v2 = vld [vmem:[%s865_s28 + $0x10] sm:$0xf] (%p43_p3) }
  0x14   : > { %185 = vst [vmem:[%s162_s29] sm:$0xf] (%p43_p3), %v184_v0  ;;  %187 = vst [vmem:[%s162_s29 + $0x4] sm:$0xf] (%p43_p3), %v186_v1  ;;  %v190_v3 = vld [vmem:[%s865_s28 + $0x18] sm:$0xf] (%p43_p3) }
  0x15   : > { %v192_v4 = vld [vmem:[%s865_s28 + $0x20] sm:$0xf]  ;;  %189 = vst [vmem:[%s162_s29 + $0x8] sm:$0xf] %v188_v2  ;;  %191 = vst [vmem:[%s162_s29 + $0xc] sm:$0xf] %v190_v3 }
  0x16   : > { %193 = vst [vmem:[%s162_s29 + $0x10] sm:$0xf] %v192_v4  ;;  %v194_v5 = vld [vmem:[%s865_s28 + $0x28] sm:$0xf]  ;;  %v196_v6 = vld [vmem:[%s865_s28 + $0x30] sm:$0xf] }
  0x17   : > { %v198_v7 = vld [vmem:[%s865_s28 + $0x38] sm:$0xf]  ;;  %195 = vst [vmem:[%s162_s29 + $0x14] sm:$0xf] %v194_v5  ;;  %197 = vst [vmem:[%s162_s29 + $0x18] sm:$0xf] %v196_v6 }
  0x18   : > { %199 = vst [vmem:[%s162_s29 + $0x1c] sm:$0xf] %v198_v7  ;;  %v200_v8 = vld [vmem:[%s865_s28 + $0x40] sm:$0xf]  ;;  %v202_v9 = vld [vmem:[%s865_s28 + $0x48] sm:$0xf] }
  0x19   : > { %v204_v10 = vld [vmem:[%s865_s28 + $0x50] sm:$0xf]  ;;  %201 = vst [vmem:[%s162_s29 + $0x20] sm:$0xf] %v200_v8  ;;  %203 = vst [vmem:[%s162_s29 + $0x24] sm:$0xf] %v202_v9 }
  0x1a   : > { %205 = vst [vmem:[%s162_s29 + $0x28] sm:$0xf] %v204_v10  ;;  %v206_v11 = vld [vmem:[%s865_s28 + $0x58] sm:$0xf]  ;;  %v208_v12 = vld [vmem:[%s865_s28 + $0x60] sm:$0xf] }
  0x1b   : > { %v210_v13 = vld [vmem:[%s865_s28 + $0x68] sm:$0xf]  ;;  %207 = vst [vmem:[%s162_s29 + $0x2c] sm:$0xf] %v206_v11  ;;  %209 = vst [vmem:[%s162_s29 + $0x30] sm:$0xf] %v208_v12 }
  0x1c   : > { %211 = vst [vmem:[%s162_s29 + $0x34] sm:$0xf] %v210_v13  ;;  %v212_v14 = vld [vmem:[%s865_s28 + $0x70] sm:$0xf]  ;;  %v214_v15 = vld [vmem:[%s865_s28 + $0x78] sm:$0xf] }
  0x1d   : > { %213 = vst [vmem:[%s162_s29 + $0x38] sm:$0xf] %v212_v14  ;;  %215 = vst [vmem:[%s162_s29 + $0x3c] sm:$0xf] %v214_v15 }
  0x1e PF: > { %p639_p8 = scmp.ge.s32.totalorder %s792_s16, 1  ;;  %p270_p9 = scmp.lt.s32.totalorder %s792_s16, 3 }
  0x20   : > { %p271_p10 = pnand %p639_p8, %p270_p9 }
  0x21   : > { %s277_s30 = sand.u32 (!%p271_p10), 1, %s776_s12  }
  0x22   : > { %274 = sbr.rel (%p271_p10) target bundleno = 267 (0x10b), region = 69  ;;  %s640_s4 = sshll.u32 (!%p271_p10), %s277_s30, 6 }
  0x23   : > { %s279_s9 = scalar_lea.vmem (!%p271_p10), [#allocation2], %s640_s4  ;;  %s641_s24 = sshll.u32 (!%p271_p10), %s277_s30, 4 }
  0x24   : > { %s304_s25 = scalar_lea.vmem (!%p271_p10), [#allocation3], %s641_s24 }
  0x27   : > { %v794_v16 = vmov 0.0   ;;  %v392_v17 = vld [vmem:[%s928_s2] sm:$0xff]  ;;  %v393_v18 = vld [vmem:[%s928_s2 + $0x8] sm:$0xff]  ;;  %vm795_vm0 = vmmov 0   ;;  %v746_v19 = vld [vmem:[%s279_s9 + $0x18] sm:$0xff]   ;;  %v796_v20 = vmov 0  }
  0x28   : > { %677 = vmatprep.subr.bf16.mxu0 %v794_v16  ;;  %689 = vmatprep.subr.bf16.mxu1 %v794_v16  ;;  %v660_v21 = vld [vmem:[%s928_s2 + $0x10] sm:$0xff]  ;;  %v661_v22 = vld [vmem:[%s928_s2 + $0x18] sm:$0xff]  ;;  %v750_v26 = vld [vmem:[%s279_s9 + $0x8] sm:$0xff]   ;;  %vm348_vm1 = vcmask 523264   ;;  %s664_s12 = sshll.u32 (%p852_p6), %s784_s14, 3 }
  0x29   : > { %685 = vmatprep.mubr.msk.bf16.mxu0 %vm795_vm0, %v794_v16  ;;  %697 = vmatprep.mubr.msk.bf16.mxu1 %vm795_vm0, %v794_v16  ;;  %v747_v23 = vld [vmem:[%s279_s9 + $0x38] sm:$0xff]   ;;  %v748_v24 = vld [vmem:[%s279_s9 + $0x10] sm:$0xff]   ;;  %v751_v27 = vld [vmem:[%s279_s9 + $0x28] sm:$0xff]   ;;  %s510_s28 = scalar_lea.vmem (%p852_p6), %s929_s3, %s664_s12 }
  0x2a   : > { %744 = vset.pattern.permute.xlu0 %v796_v20  ;;  %745 = vset.pattern.permute.xlu1 %v796_v20  ;;  %v749_v25 = vld [vmem:[%s279_s9 + $0x30] sm:$0xff]   ;;  %v752_v28 = vld [vmem:[%s279_s9] sm:$0xff]  }
  0x2b   : > { %396 = vperm.xlu0 %744, %v392_v17   ;;  %402 = vperm.xlu1 %745, %v393_v18   ;;  %v753_v29 = vld [vmem:[%s279_s9 + $0x20] sm:$0xff]  }
  0x2c   : > { %678 = vmatpush3.bf16.msra.mxu0 %v746_v19  ;;  %690 = vmatpush3.bf16.msra.mxu1 %v747_v23  ;;  %v315_v30 = vld [vmem:[%s927_s1] sm:$0xf] }
  0x2d   : > { %679 = vmatprep.subr.bf16.mxu0 %v794_v16  ;;  %691 = vmatprep.subr.bf16.mxu1 %v794_v16 }
  0x2f   : > { %486 = vperm.xlu0 %744, %v660_v21   ;;  %492 = vperm.xlu1 %745, %v661_v22  }
  0x30   : > { %680 = vmatpush3.bf16.msra.mxu0 %v748_v24  ;;  %692 = vmatpush3.bf16.msra.mxu1 %v749_v25 }
  0x31   : > { %681 = vmatprep.subr.bf16.mxu0 %v794_v16  ;;  %693 = vmatprep.subr.bf16.mxu1 %v794_v16 }
  0x34   : > { %682 = vmatpush3.bf16.msra.mxu0 %v750_v26  ;;  %694 = vmatpush3.bf16.msra.mxu1 %v751_v27 }
  0x35   : > { %683 = vmatprep.subr.bf16.mxu0 %v794_v16  ;;  %695 = vmatprep.subr.bf16.mxu1 %v794_v16 }
  0x38   : > { %684 = vmatpush3.bf16.msra.mxu0 %v752_v28  ;;  %696 = vmatpush3.bf16.msra.mxu1 %v753_v29 }
  0x3b   : > { %686 = vmatmul.mubr.msk.bf16.vlgmr.msra.gmra.mxu0 %vm348_vm1, %v315_v30  ;;  %698 = vmatmul.mubr.msk.bf16.vlgmr.msra.gmra.mxu1 %vm348_vm1, %v315_v30 }
  0xa6   : > { %v397_v31 = vpop.permute.xlu0 %396  ;;  %v403_v32 = vpop.permute.xlu1 %402 }
  0xaa   : > { %v487_v34 = vpop.permute.xlu0 %486  ;;  %v493_v39 = vpop.permute.xlu1 %492 }
  0xfb   : > { %v386_v33 = vpop.f32.mrf.mxu0  ;;  %v475_v36 = vpop.f32.mrf.mxu1 }
  0xfc   : > { %v399_v35 = vmul.f32 %v397_v31, %v386_v33  ;;  %v489_v37 = vmul.f32 %v487_v34, %v475_v36 }
  0xfd   : > { %v687_v38 = vpop.f32.mrf.mxu0  ;;  %v699_v41 = vpop.f32.mrf.mxu1 }
  0xfe   : > { %v405_v40 = vadd.f32 %v403_v32, %v399_v35  ;;  %v495_v42 = vadd.f32 %v493_v39, %v489_v37  ;;  %505 = sbr.rel (!%p852_p6) target bundleno = 267 (0x10b), region = 77 }
  0xff   : > { %v389_v43 = vpop.f32.mrf.mxu0  ;;  %v478_v45 = vpop.f32.mrf.mxu1 }
 0x100   : > { %v406_v44 = vmax.f32 %v405_v40, 0.0  ;;  %v496_v46 = vmax.f32 %v495_v42, 0.0 }
 0x101   : > { %v688_v47 = vpop.f32.mrf.mxu0  ;;  %v700_v48 = vpop.f32.mrf.mxu1 }
 0x102   : > { %407 = vst [vmem:[%s304_s25] sm:$0xff] %v406_v44  ;;  %662 = vst [vmem:[%s304_s25 + $0x8] sm:$0xff] %v496_v46 }
 0x109   : > { %v541_v49 = vld [vmem:[%s304_s25] sm:$0xff]  ;;  %v543_v50 = vld [vmem:[%s304_s25 + $0x8] sm:$0xff] }
 0x10a   : > { %542 = vst [vmem:[%s510_s28] sm:$0xff] %v541_v49  ;;  %544 = vst [vmem:[%s510_s28 + $0x10] sm:$0xff] %v543_v50 }
 0x10b PF: > { %s13_s16 = sadd.s32 1, %s792_s16   ;;  %s931_s12 = smov %s780_s13 }
 0x10c   : > { %p10_p11 = scmp.ge.s32.totalorder %s13_s16, 4   ;;  %s932_s13 = smov %s857_s22 }
 0x10d   : > { %s933_s14 = smov %s788_s15  ;;  %s934_s15 = smov %s936_s17 }
 0x10e   :  { %12 = sbr.rel (!%p10_p11) target bundleno = 3 (0x3), region = 152 }

</bundles_post_ra>
